<compile_context>
chip_gen: v6e
topology: v6e:2x2x1
jax: 0.10.0
libtpu: 0.0.40
codegen_flags: <defaults>
</compile_context>

<pallas_src>
import numpy as np
import jax
import jax.numpy as jnp
from jax.experimental import pallas as pl
from jax.experimental.pallas import tpu as pltpu


def _detr_post_kernel(thr_ref, logits_ref, boxes_ref, out_ref):
    # thr_ref    : SMEM (1,) float32 scalar-prefetch score threshold
    # logits_ref : (Bb, Q, C) native dtype (cast to f32 here; no wrapper copy)
    # boxes_ref  : (Bb, 4, Q) lane-major cxcywh
    # out_ref    : (Bb, 8, Q) packed rows [x0, y0, x1, y1, cls, conf, keep, 0]
    thr = thr_ref[0]

    logits = logits_ref[...].astype(jnp.float32)                 # (Bb, Q, C)
    c = logits.shape[-1]

    # Mask (not slice) the trailing no-object class: avoids the relayout copy
    # a (C-1)-wide minor-axis slice would force.
    col = jax.lax.broadcasted_iota(jnp.int32, logits.shape, 2)   # (Bb, Q, C)
    is_obj = col < (c - 1)

    obj = jnp.where(is_obj, logits, -jnp.inf)
    m_obj = jnp.max(obj, axis=-1, keepdims=True)                 # (Bb, Q, 1)

    # m_all = max over ALL classes = max(m_obj, no-object logit): one cheap
    # width-1 lane extract + VPU max instead of a second full C-wide reduce.
    no_obj = logits[:, :, c - 1:c]                               # (Bb, Q, 1)
    m_all = jnp.maximum(m_obj, no_obj)                           # (Bb, Q, 1)

    sum_e = jnp.sum(jnp.exp(logits - m_all), axis=-1)            # (Bb, Q)

    # argmax over object classes == argmax of softmax probs (monotonic);
    # min-of-index on ties gives torch.max's first-occurrence tie-break.
    cls = jnp.min(jnp.where(obj == m_obj, col, c - 1), axis=-1)  # (Bb, Q) int32

    # Exact division (EUP/VPU have slack here): keeps conf>thr bit-faithful.
    conf = jnp.exp(m_obj[:, :, 0] - m_all[:, :, 0]) / sum_e      # (Bb, Q)
    keep = (conf > thr).astype(jnp.float32)                      # decided in f32

    boxes = boxes_ref[...].astype(jnp.float32)                   # (Bb, 4, Q)
    xc = boxes[:, 0, :]
    yc = boxes[:, 1, :]
    w = boxes[:, 2, :]
    h = boxes[:, 3, :]

    packed = jnp.stack(
        [xc - 0.5 * w, yc - 0.5 * h, xc + 0.5 * w, yc + 0.5 * h,
         cls.astype(jnp.float32), conf, keep, jnp.zeros_like(conf)],
        axis=1)                                                  # (Bb, 8, Q)
    out_ref[...] = packed.astype(out_ref.dtype)                  # one dense store


def _tpu_caps():
    """Best-effort (vmem_capacity_bytes, has_2_tensorcores, is_v5e)."""
    vmem_cap = 128 << 20
    two_core = False
    v5e = False
    try:
        info = pltpu.get_tpu_info()
        vmem_cap = int(getattr(info, "vmem_capacity_bytes", vmem_cap))
    except Exception:
        pass
    try:
        dk = jax.devices()[0].device_kind.lower()
        two_core = any(t in dk for t in ("v4", "v5p", "v7"))
        v5e = ("v5 lite" in dk) or ("v5e" in dk) or ("v5litepod" in dk)
    except Exception:
        pass
    return vmem_cap, two_core, v5e


def _pick_block(B, Q, C, in_itemsize, out_itemsize, vmem_cap, two_core):
    # Bytes resident in VMEM per batch element per block: double-buffered I/O
    # blocks PLUS ~4 block-sized in-kernel f32 temporaries (cast, exp, iota,
    # where) that the previous sizing ignored.
    per_b = (2 * Q * C * in_itemsize        # logits input, double-buffered
             + 4 * Q * C * 4                # in-kernel f32 temporaries
             + 2 * 8 * Q * 4                # boxes (4 -> 8 sublanes), dbl-buf
             + 2 * 8 * Q * out_itemsize)    # packed output, double-buffered
    # Smaller block budget on small-VMEM parts (v7x: 64 MiB physical).
    budget = (4 << 20) if vmem_cap <= (64 << 20) else (8 << 20)
    bb_fit = max(1, budget // per_b)

    # Pipeline depth: >= 4 grid steps (>= 8 on 2-TensorCore chips) so block
    # i+1's DMA overlaps block i's compute, but keep blocks >= ~1 MiB so the
    # ~0.35 us/step overhead stays small.
    target_steps = 8 if two_core else 4
    desired_steps = max(1, min(B, target_steps))
    bb_depth = max(1, B // desired_steps)
    bb_floor = max(1, min(bb_fit, -(-(1 << 20) // per_b)))
    bb_cap = max(1, min(B, bb_fit, max(bb_depth, bb_floor)))

    # Bb must divide B: no wrapper jnp.pad copy, no ragged tail block.
    divisors = [d for d in range(1, bb_cap + 1) if B % d == 0]
    bb = divisors[-1]
    if two_core:
        # Even block count -> the "parallel" axis splits evenly across both TCs.
        even = [d for d in divisors if (B // d) % 2 == 0]
        if even:
            bb = even[-1]

    block_bytes = bb * per_b
    hard_cap = (36 << 20) if vmem_cap <= (64 << 20) else (64 << 20)
    vmem_limit = int(min(hard_cap, max(32 << 20, block_bytes + (4 << 20))))
    return bb, vmem_limit


def detr_postprocess_packed(pred_logits, pred_boxes, score_threshold,
                            out_dtype=None):
    """Kernel output: (B, 8, Q) packed rows [x0, y0, x1, y1, cls, conf, keep, 0]."""
    B, Q, C = pred_logits.shape
    vmem_cap, two_core, v5e = _tpu_caps()
    if out_dtype is None:
        # bf16 writeback on v5e (lowest HBM BW, 1 vector-store slot); cls and
        # keep are exact in bf16 and keep was decided in f32 in-kernel.
        out_dtype = jnp.bfloat16 if v5e else jnp.float32
    out_itemsize = np.dtype(out_dtype).itemsize

    # Logits: native dtype & layout, untouched (no cast / pad / transpose).
    # Boxes (small tensor) go lane-major so box math + store are full-width.
    boxes_t = jnp.transpose(pred_boxes, (0, 2, 1))                   # (B, 4, Q)
    thr = jnp.asarray(score_threshold, jnp.float32).reshape(-1)[:1]  # robust (1,)

    bb, vmem_limit = _pick_block(B, Q, C, pred_logits.dtype.itemsize,
                                 out_itemsize, vmem_cap, two_core)
    n_blocks = B // bb

    grid_spec = pltpu.PrefetchScalarGridSpec(
        num_scalar_prefetch=1,
        grid=(n_blocks,),
        in_specs=[
            pl.BlockSpec((bb, Q, C), lambda i, _thr: (i, 0, 0)),
            pl.BlockSpec((bb, 4, Q), lambda i, _thr: (i, 0, 0)),
        ],
        out_specs=pl.BlockSpec((bb, 8, Q), lambda i, _thr: (i, 0, 0)),
    )
    return pl.pallas_call(
        _detr_post_kernel,
        out_shape=jax.ShapeDtypeStruct((B, 8, Q), out_dtype),
        grid_spec=grid_spec,
        compiler_params=pltpu.CompilerParams(
            dimension_semantics=("parallel",),
            vmem_limit_bytes=vmem_limit,
        ),
    )(thr, pred_logits, boxes_t)


def detr_postprocess(pred_logits, pred_boxes, score_threshold):
    """Full module semantics: tuple (one array per image) of shape (K_i, 6) =
    [x0, y0, x1, y1, cls_label, conf] for queries with conf > threshold."""
    packed = detr_postprocess_packed(pred_logits, pred_boxes, score_threshold)
    # TODO(synk): torch.nonzero / index_select produce data-dependent shapes;
    # the per-image compaction has no static-shape Pallas equivalent, so it is
    # done on host numpy straight from the single packed device->host transfer
    # (no extra device-side transpose/slice kernels).
    pk = np.asarray(jax.device_get(packed), dtype=np.float32)        # (B, 8, Q)
    results = []
    for b in range(pk.shape[0]):
        keep = pk[b, 6, :] > 0.5
        feats = pk[b, :6, :].T[keep]                                 # (K_b, 6)
        results.append(np.ascontiguousarray(feats))
    return tuple(results)


if __name__ == "__main__":
    B, Q, C = 2, 16, 8      # batch, num queries, num classes (incl. no-object)
    key = jax.random.PRNGKey(0)
    k1, k2 = jax.random.split(key)
    pred_logits = jax.random.normal(k1, (B, Q, C), dtype=jnp.float32)
    pred_boxes = jax.random.uniform(k2, (B, Q, 4), dtype=jnp.float32)
    score_threshold = jnp.array([0.2], dtype=jnp.float32)

    packed = detr_postprocess_packed(pred_logits, pred_boxes, score_threshold)
    jax.block_until_ready(packed)

    # Light correctness check against a pure-JAX reference.
    probs = jax.nn.softmax(pred_logits.astype(jnp.float32), axis=-1)[:, :, :-1]
    conf_ref = np.asarray(jnp.max(probs, axis=-1))
    cls_ref = np.asarray(jnp.argmax(probs, axis=-1))
    bx = np.asarray(pred_boxes, dtype=np.float32)
    xc, yc, w, h = bx[..., 0], bx[..., 1], bx[..., 2], bx[..., 3]
    boxes_ref = np.stack(
        [xc - 0.5 * w, yc - 0.5 * h, xc + 0.5 * w, yc + 0.5 * h], axis=-1)

    pk = np.asarray(packed, dtype=np.float32)
    atol = 3e-2 if packed.dtype == jnp.dtype(jnp.bfloat16) else 1e-5
    np.testing.assert_allclose(pk[:, :4, :].transpose(0, 2, 1), boxes_ref,
                               rtol=0, atol=atol)
    np.testing.assert_allclose(pk[:, 5, :], conf_ref, rtol=0, atol=atol)
    assert np.array_equal(pk[:, 4, :].astype(np.int32), cls_ref.astype(np.int32))
    far = np.abs(conf_ref - 0.2) > 1e-3   # ignore exact threshold boundary
    assert np.array_equal((pk[:, 6, :] > 0.5)[far], (conf_ref > 0.2)[far])

    results = detr_postprocess(pred_logits, pred_boxes, score_threshold)
    _ = [np.asarray(r) for r in results]

    print("KERNEL_OK")
</pallas_src>

<mosaic_0001>
module attributes {stable_mosaic.version = 11 : i64} {
  func.func @_detr_post_kernel(%arg0: i32, %arg1: memref<1xf32, #tpu.memory_space<smem>>, %arg2: memref<2x16x8xf32, #tpu.memory_space<vmem>>, %arg3: memref<2x4x16xf32, #tpu.memory_space<vmem>>, %arg4: memref<2x8x16xf32, #tpu.memory_space<vmem>>) attributes {dimension_semantics = [#tpu.dimension_semantics<parallel>], iteration_bounds = array<i64: 1>, scalar_prefetch = 1 : i64, scratch_operands = 0 : i64, tpu.core_type = #tpu.core_type<tc>, window_params = [{transform_indices = @transform_0, window_bounds = array<i64: 2, 16, 8>}, {transform_indices = @transform_1, window_bounds = array<i64: 2, 4, 16>}, {transform_indices = @transform_2, window_bounds = array<i64: 2, 8, 16>}]} {
    %c0 = arith.constant 0 : index
    %0 = memref.load %arg1[%c0] : memref<1xf32, #tpu.memory_space<smem>>
    %c0_0 = arith.constant 0 : index
    %c0_1 = arith.constant 0 : index
    %c0_2 = arith.constant 0 : index
    %1 = vector.load %arg2[%c0_0, %c0_1, %c0_2] : memref<2x16x8xf32, #tpu.memory_space<vmem>>, vector<2x16x8xf32>
    %2 = tpu.iota {dimensions = array<i32: 2>} : vector<2x16x8xi32>
    %c7_i32 = arith.constant 7 : i32
    %3 = vector.broadcast %c7_i32 : i32 to vector<2x16x8xi32>
    %4 = arith.cmpi slt, %2, %3 : vector<2x16x8xi32>
    %cst = arith.constant 0xFF800000 : f32
    %5 = vector.broadcast %cst : f32 to vector<2x16x8xf32>
    %6 = arith.select %4, %1, %5 : vector<2x16x8xi1>, vector<2x16x8xf32>
    %cst_3 = arith.constant dense<0xFF800000> : vector<2x16xf32>
    %7 = vector.multi_reduction <maximumf>, %6, %cst_3 [2] : vector<2x16x8xf32> to vector<2x16xf32>
    %8 = vector.shape_cast %7 : vector<2x16xf32> to vector<2x16x1xf32>
    %9 = vector.extract_strided_slice %1 {offsets = [0, 0, 7], sizes = [2, 16, 1], strides = [1, 1, 1]} : vector<2x16x8xf32> to vector<2x16x1xf32>
    %10 = arith.maximumf %8, %9 : vector<2x16x1xf32>
    %11 = vector.broadcast %10 : vector<2x16x1xf32> to vector<2x16x8xf32>
    %12 = arith.subf %1, %11 : vector<2x16x8xf32>
    %13 = math.exp %12 : vector<2x16x8xf32>
    %cst_4 = arith.constant dense<0.000000e+00> : vector<2x16xf32>
    %14 = vector.multi_reduction <add>, %13, %cst_4 [2] : vector<2x16x8xf32> to vector<2x16xf32>
    %15 = vector.broadcast %8 : vector<2x16x1xf32> to vector<2x16x8xf32>
    %16 = arith.cmpf oeq, %6, %15 : vector<2x16x8xf32>
    %c7_i32_5 = arith.constant 7 : i32
    %17 = vector.broadcast %c7_i32_5 : i32 to vector<2x16x8xi32>
    %18 = arith.select %16, %2, %17 : vector<2x16x8xi1>, vector<2x16x8xi32>
    %cst_6 = arith.constant dense<2147483647> : vector<2x16xi32>
    %19 = vector.multi_reduction <minsi>, %18, %cst_6 [2] : vector<2x16x8xi32> to vector<2x16xi32>
    %20 = vector.shape_cast %8 : vector<2x16x1xf32> to vector<2x16xf32>
    %21 = vector.shape_cast %10 : vector<2x16x1xf32> to vector<2x16xf32>
    %22 = arith.subf %20, %21 : vector<2x16xf32>
    %23 = math.exp %22 : vector<2x16xf32>
    %24 = arith.divf %23, %14 : vector<2x16xf32>
    %25 = vector.broadcast %0 : f32 to vector<2x16xf32>
    %26 = arith.cmpf ogt, %24, %25 : vector<2x16xf32>
    %27 = arith.extui %26 : vector<2x16xi1> to vector<2x16xi32>
    %28 = arith.sitofp %27 : vector<2x16xi32> to vector<2x16xf32>
    %c0_7 = arith.constant 0 : index
    %c0_8 = arith.constant 0 : index
    %c0_9 = arith.constant 0 : index
    %29 = vector.load %arg3[%c0_7, %c0_8, %c0_9] : memref<2x4x16xf32, #tpu.memory_space<vmem>>, vector<2x4x16xf32>
    %30 = vector.extract_strided_slice %29 {offsets = [0, 0, 0], sizes = [2, 1, 16], strides = [1, 1, 1]} : vector<2x4x16xf32> to vector<2x1x16xf32>
    %31 = vector.shape_cast %30 : vector<2x1x16xf32> to vector<2x16xf32>
    %32 = vector.extract_strided_slice %29 {offsets = [0, 1, 0], sizes = [2, 1, 16], strides = [1, 1, 1]} : vector<2x4x16xf32> to vector<2x1x16xf32>
    %33 = vector.shape_cast %32 : vector<2x1x16xf32> to vector<2x16xf32>
    %34 = vector.extract_strided_slice %29 {offsets = [0, 2, 0], sizes = [2, 1, 16], strides = [1, 1, 1]} : vector<2x4x16xf32> to vector<2x1x16xf32>
    %35 = vector.shape_cast %34 : vector<2x1x16xf32> to vector<2x16xf32>
    %36 = vector.extract_strided_slice %29 {offsets = [0, 3, 0], sizes = [2, 1, 16], strides = [1, 1, 1]} : vector<2x4x16xf32> to vector<2x1x16xf32>
    %37 = vector.shape_cast %36 : vector<2x1x16xf32> to vector<2x16xf32>
    %cst_10 = arith.constant 5.000000e-01 : f32
    %38 = vector.broadcast %cst_10 : f32 to vector<2x16xf32>
    %39 = arith.mulf %38, %35 : vector<2x16xf32>
    %40 = arith.subf %31, %39 : vector<2x16xf32>
    %cst_11 = arith.constant 5.000000e-01 : f32
    %41 = vector.broadcast %cst_11 : f32 to vector<2x16xf32>
    %42 = arith.mulf %41, %37 : vector<2x16xf32>
    %43 = arith.subf %33, %42 : vector<2x16xf32>
    %cst_12 = arith.constant 5.000000e-01 : f32
    %44 = vector.broadcast %cst_12 : f32 to vector<2x16xf32>
    %45 = arith.mulf %44, %35 : vector<2x16xf32>
    %46 = arith.addf %31, %45 : vector<2x16xf32>
    %cst_13 = arith.constant 5.000000e-01 : f32
    %47 = vector.broadcast %cst_13 : f32 to vector<2x16xf32>
    %48 = arith.mulf %47, %37 : vector<2x16xf32>
    %49 = arith.addf %33, %48 : vector<2x16xf32>
    %50 = arith.sitofp %19 : vector<2x16xi32> to vector<2x16xf32>
    %cst_14 = arith.constant 0.000000e+00 : f32
    %51 = vector.broadcast %cst_14 : f32 to vector<2x16xf32>
    %52 = vector.shape_cast %40 : vector<2x16xf32> to vector<2x1x16xf32>
    %53 = vector.shape_cast %43 : vector<2x16xf32> to vector<2x1x16xf32>
    %54 = vector.shape_cast %46 : vector<2x16xf32> to vector<2x1x16xf32>
    %55 = vector.shape_cast %49 : vector<2x16xf32> to vector<2x1x16xf32>
    %56 = vector.shape_cast %50 : vector<2x16xf32> to vector<2x1x16xf32>
    %57 = vector.shape_cast %24 : vector<2x16xf32> to vector<2x1x16xf32>
    %58 = vector.shape_cast %28 : vector<2x16xf32> to vector<2x1x16xf32>
    %59 = vector.shape_cast %51 : vector<2x16xf32> to vector<2x1x16xf32>
    %60 = tpu.concatenate %52, %53, %54, %55, %56, %57, %58, %59 in 1 : vector<2x1x16xf32>, vector<2x1x16xf32>, vector<2x1x16xf32>, vector<2x1x16xf32>, vector<2x1x16xf32>, vector<2x1x16xf32>, vector<2x1x16xf32>, vector<2x1x16xf32> -> vector<2x8x16xf32>
    %c0_15 = arith.constant 0 : index
    %c0_16 = arith.constant 0 : index
    %c0_17 = arith.constant 0 : index
    %61 = vector.load %arg4[%c0_15, %c0_16, %c0_17] : memref<2x8x16xf32, #tpu.memory_space<vmem>>, vector<2x8x16xf32>
    tpu.vector_store %arg4[%c0_15, %c0_16, %c0_17], %60 {strides = array<i32>} : memref<2x8x16xf32, #tpu.memory_space<vmem>>, vector<2x8x16xf32>,
    return
  }
  func.func @transform_0(%arg0: i32, %arg1: memref<1xf32, #tpu.memory_space<smem>>) -> (i32, i32, i32) {
    %c0_i32 = arith.constant 0 : i32
    %c0_i32_0 = arith.constant 0 : i32
    %c0_i32_1 = arith.constant 0 : i32
    return %arg0, %c0_i32, %c0_i32_0 : i32, i32, i32
  }
  func.func @transform_1(%arg0: i32, %arg1: memref<1xf32, #tpu.memory_space<smem>>) -> (i32, i32, i32) {
    %c0_i32 = arith.constant 0 : i32
    %c0_i32_0 = arith.constant 0 : i32
    %c0_i32_1 = arith.constant 0 : i32
    return %arg0, %c0_i32, %c0_i32_0 : i32, i32, i32
  }
  func.func @transform_2(%arg0: i32, %arg1: memref<1xf32, #tpu.memory_space<smem>>) -> (i32, i32, i32) {
    %c0_i32 = arith.constant 0 : i32
    %c0_i32_0 = arith.constant 0 : i32
    %c0_i32_1 = arith.constant 0 : i32
    return %arg0, %c0_i32, %c0_i32_0 : i32, i32, i32
  }
}

</mosaic_0001>

<bundles_post_ra>
// kernel: tpu_custom_call.1
= control target key start
LH: loop header
LB: loop body
LE: loop exit
PB: predicated region body
PF: predicated region fallthrough
CT: control target
= control target key end

     0   :  { %v19_v0 = vlaneseq  ;;  %s556_s0 = inlined_call_operand.<no memory space> [shape: f32[1], index: 0, kind: input, shape index: {}]   ;;  %s557_s1 = inlined_call_operand.vmem [shape: f32[2,16,8], index: 1, kind: input, shape index: {}]   ;;  %s558_s2 = inlined_call_operand.vmem [shape: f32[2,4,16], index: 2, kind: input, shape index: {}]   ;;  %s559_s3 = inlined_call_operand.hbm [shape: f32[2,8,16], index: 3, kind: output, shape index: {}]  }
   0x1   :  { %v15_v1 = vld [vmem:[%s557_s1] sm:$0xff] }
   0x2   :  { %9 = vsyncpa [#allocation5], 0  ;;  %v443_v2 = vand.u32 127, %v19_v0  ;;  %v16_v3 = vld [vmem:[%s557_s1 + $0x8] sm:$0xff]  ;;  %v17_v4 = vld [vmem:[%s557_s1 + $0x10] sm:$0xff]  ;;  %vm26_vm0 = vcmask 64512  }
   0x3   :  { %v18_v5 = vld [vmem:[%s557_s1 + $0x18] sm:$0xff]  ;;  %v414_v14 = vmov 7   ;;  %vm310_vm14 = vcmask 1041408   ;;  %vm313_vm15 = vcmask 1042432  }
   0x4   :  { %vm21_vm1 = vcmp.lt.s32.totalorder %v443_v2, 7  ;;  %356 = vset.pattern.permute.xlu0 %v414_v14  ;;  %357 = vset.pattern.permute.xlu1 %v414_v14 }
   0x5   :  { %v22_v6 = vsel %vm21_vm1, %v15_v1, -inf  ;;  %v23_v7 = vsel %vm21_vm1, %v16_v3, -inf  ;;  %v24_v8 = vsel %vm21_vm1, %v17_v4, -inf  ;;  %v455_v9 = vsel %vm21_vm1, %v18_v5, -inf }
   0x6   :  { %v27_v10 = vsel %vm26_vm0, %v22_v6, -inf  ;;  %v33_v11 = vsel %vm26_vm0, %v24_v8, -inf  ;;  %v30_v12 = vsel %vm26_vm0, %v23_v7, -inf  ;;  %v36_v13 = vsel %vm26_vm0, %v455_v9, -inf }
   0x7   :  { %28 = vmax.xlane.f32.xlu0 %v27_v10  ;;  %34 = vmax.xlane.f32.xlu1 %v33_v11  ;;  %vm316_vm1 = vcmask 1043456  }
   0xb   :  { %31 = vmax.xlane.f32.xlu0 %v30_v12  ;;  %37 = vmax.xlane.f32.xlu1 %v36_v13 }
  0x90   :  { %v462_v15 = vpop.xlane.xlu0 %28  ;;  %v464_v16 = vpop.xlane.xlu1 %34 }
  0x91   :  { %v467_v17 = vmax.f32 %v462_v15, %v15_v1  ;;  %v470_v18 = vmax.f32 %v464_v16, %v17_v4  ;;  %vm87_vm2 = vcmp.eq.f32.partialorder %v22_v6, %v462_v15  ;;  %vm89_vm4 = vcmp.eq.f32.partialorder %v24_v8, %v464_v16 }
  0x92   :  { %v91_v25 = vsel %vm87_vm2, %v443_v2, 7  ;;  %v93_v45 = vsel %vm89_vm4, %v443_v2, 7  ;;  %vm319_vm2 = vcmask 1044480   ;;  %vm325_vm4 = vcmask 1046528  }
  0x93   :  { %v155_v19 = vsub.f32 %v462_v15, %v467_v17  ;;  %45 = vperm.xlu0 %356, %v467_v17   ;;  %v157_v20 = vsub.f32 %v464_v16, %v470_v18  ;;  %v95_v26 = vsel %vm26_vm0, %v91_v25, 2147483647  ;;  %v125_v48 = vsel %vm26_vm0, %v93_v45, 2147483647  ;;  %v189_v45 = vld [vmem:[%s558_s2 + $0x4] sm:$0xf] }
  0x94   :  { %v477_v21 = vpop.xlane.xlu0 %31  ;;  %v483_v23 = vpop.xlane.xlu1 %37  ;;  %v97_v28 = vshra.s32 %v95_v26, 16  ;;  %v127_v50 = vshra.s32 %v125_v48, 16  ;;  %v96_v61 = vand.u32 65535, %v95_v26  ;;  %v126_v14 = vand.u32 65535, %v125_v48 }
  0x95   :  { %v480_v22 = vmax.f32 %v477_v21, %v16_v3  ;;  %v487_v24 = vmax.f32 %v483_v23, %v18_v5  ;;  %vm88_vm3 = vcmp.eq.f32.partialorder %v23_v7, %v477_v21  ;;  %vm90_vm5 = vcmp.eq.f32.partialorder %v455_v9, %v483_v23 }
  0x96   :  { %v92_v27 = vsel %vm88_vm3, %v443_v2, 7  ;;  %v99_v30 = vcvt.s32.f32 %v97_v28  ;;  %v94_v52 = vsel %vm90_vm5, %v443_v2, 7  ;;  %v129_v54 = vcvt.s32.f32 %v127_v50 }
  0x97   :  { %50 = vperm.xlu1 %357, %v480_v22   ;;  %v110_v29 = vsel %vm26_vm0, %v92_v27, 2147483647  ;;  %v140_v56 = vsel %vm26_vm0, %v94_v52, 2147483647  ;;  %v98_v63 = vcvt.s32.f32 %v96_v61  ;;  %v159_v7 = vmul.f32 1.442695, %v155_v19 }
  0x98   :  { %v112_v31 = vshra.s32 %v110_v29, 16  ;;  %v142_v58 = vshra.s32 %v140_v56, 16  ;;  %v156_v8 = vsub.f32 %v477_v21, %v480_v22  ;;  %v163_v11 = vmul.f32 1.442695, %v157_v20 }
  0x99   :  { %v158_v12 = vsub.f32 %v483_v23, %v487_v24  ;;  %v128_v21 = vcvt.s32.f32 %v126_v14  ;;  %v141_v26 = vand.u32 65535, %v140_v56  ;;  %v175_v27 = vstv %s556_s0 }
  0x9a   :  { %v114_v32 = vcvt.s32.f32 %v112_v31  ;;  %v144_v60 = vcvt.s32.f32 %v142_v58  ;;  %v161_v9 = vmul.f32 1.442695, %v156_v8  ;;  %v191_v48 = vmul.f32 0.5, %v189_v45 }
  0x9b   :  { %55 = vperm.xlu1 %357, %v470_v18   ;;  %v165_v15 = vmul.f32 1.442695, %v158_v12  ;;  %v220_v8 = vadd.s32 4294967288, %v443_v2  ;;  %vm322_vm3 = vcmask 1045504   ;;  %vm328_vm5 = vcmask 130048  }
  0x9f   :  { %60 = vperm.xlu1 %357, %v487_v24   ;;  %v143_v24 = vcvt.s32.f32 %v141_v26 }
  0xc3   :  { %100 = vmin.xlane.f32.xlu1 %v99_v30 }
  0xc7   :  { %115 = vmin.xlane.f32.xlu1 %v114_v32 }
 0x10e   :  { %v46_v33 = vpop.permute.xlu0 %45 }
 0x10f   :  { %v63_v34 = vsub.f32 %v15_v1, %v46_v33  ;;  %v111_v1 = vand.u32 65535, %v110_v29 }
 0x111   :  { %v67_v35 = vmul.f32 1.442695, %v63_v34  ;;  %v415_v34 = vmov 0.0  }
 0x112   :  { %v51_v36 = vpop.permute.xlu1 %50 }
 0x113   :  { %368 = vpow2.f32 %v67_v35  ;;  %v64_v37 = vsub.f32 %v16_v3, %v51_v36 }
 0x115   :  { %v69_v38 = vmul.f32 1.442695, %v64_v37 }
 0x116   :  { %v56_v39 = vpop.permute.xlu1 %55 }
 0x117   :  { %370 = vpow2.f32 %v69_v38  ;;  %v65_v40 = vsub.f32 %v17_v4, %v56_v39 }
 0x119   :  { %v71_v41 = vmul.f32 1.442695, %v65_v40 }
 0x11a   :  { %v61_v42 = vpop.permute.xlu1 %60 }
 0x11b   :  { %372 = vpow2.f32 %v71_v41  ;;  %v66_v43 = vsub.f32 %v18_v5, %v61_v42  ;;  %v113_v5 = vcvt.s32.f32 %v111_v1 }
 0x11d   :  { %v73_v44 = vmul.f32 1.442695, %v66_v43 }
 0x11f   :  { %374 = vpow2.f32 %v73_v44 }
 0x120   :  { %v369_v46 = vpop.eup %368  ;;  %376 = vpow2.f32 %v159_v7 }
 0x121   :  { %v75_v47 = vsel %vm26_vm0, %v369_v46, 0.0  ;;  %v188_v46 = vld [vmem:[%s558_s2] sm:$0xf]  ;;  %s416_s2 = smov [#allocation4]  }
 0x122   :  { %76 = vadd.xlane.f32.xlu1 %v75_v47  ;;  %s336_s24 = sshll.u32 %s416_s2, 4  ;;  %s337_s24 = int_to_ptr.vmem [resolvable:$true] %s336_s24 }
 0x123   :  { %s392_s25 = scalar_lea.vmem %s337_s24, 256  ;;  %p397_p1 = scmp.lt.s32.totalorder %s337_s24, %s337_s24 }
 0x124   :  { %v371_v49 = vpop.eup %370  ;;  %p393_p0 = scmp.ne.s32.totalorder %s337_s24, %s392_s25  ;;  %p398_p2 = scmp.lt.s32.totalorder %s392_s25, %s392_s25 }
 0x125   :  { %v78_v51 = vsel %vm26_vm0, %v371_v49, 0.0  ;;  %v190_v49 = vmul.f32 0.5, %v188_v46 }
 0x126   :  { %79 = vadd.xlane.f32.xlu0 %v78_v51  ;;  %v195_v51 = vrot.slane %v191_v48, 2  ;;  %p399_p3 = por %p398_p2, %p397_p1 }
 0x128   :  { %v373_v53 = vpop.eup %372  ;;  %p400_p4 = pnand %p399_p3, %p393_p0 }
 0x129   :  { %v81_v55 = vsel %vm26_vm0, %v373_v53, 0.0 }
 0x12a   :  { %130 = vmin.xlane.f32.xlu0 %v129_v54  ;;  %82 = vadd.xlane.f32.xlu1 %v81_v55 }
 0x12c   :  { %v375_v57 = vpop.eup %374 }
 0x12d   :  { %v84_v59 = vsel %vm26_vm0, %v375_v57, 0.0  ;;  %v377_v16 = vpop.eup %376  ;;  %vm225_vm0 = vcmask 130112  }
 0x12e   :  { %85 = vadd.xlane.f32.xlu1 %v84_v59  ;;  %v201_v59 = vadd.f32 %v195_v51, %v189_v45 }
 0x130   :  { %v209_v12 = vrot.slane %v201_v59, 6 }
 0x132   :  { %145 = vmin.xlane.f32.xlu1 %v144_v60 }
 0x14c   :  { %v507_v62 = vpop.xlane.xlu1 %100 }
 0x14d   :  { %vm102_vm6 = vcmp.eq.f32.partialorder %v99_v30, %v507_v62  ;;  %v107_v56 = vcvt.f32.s32 %v507_v62 }
 0x14e   :  { %v103_v3 = vsel %vm102_vm6, %v98_v63, inf }
 0x14f   :  { %104 = vmin.xlane.f32.xlu0 %v103_v3  ;;  %v108_v3 = vshll.u32 %v107_v56, 16 }
 0x150   :  { %v510_v4 = vpop.xlane.xlu1 %115 }
 0x151   :  { %vm117_vm7 = vcmp.eq.f32.partialorder %v114_v32, %v510_v4  ;;  %v122_v55 = vcvt.f32.s32 %v510_v4  ;;  %v199_v4 = vsub.f32 %v189_v45, %v195_v51 }
 0x152   :  { %v118_v6 = vsel %vm117_vm7, %v113_v5, inf  ;;  %v217_v5 = vshrl.u32 %v19_v0, 7 }
 0x153   :  { %119 = vmin.xlane.f32.xlu1 %v118_v6  ;;  %v123_v1 = vshll.u32 %v122_v55, 16 }
 0x1ab   :  { %v77_v10 = vpop.xlane.xlu1 %76 }
 0x1ac   :  { %378 = vrcp.f32 %v77_v10 }
 0x1ad   :  { %380 = vpow2.f32 %v161_v9 }
 0x1af   :  { %v80_v13 = vpop.xlane.xlu0 %79 }
 0x1b0   :  { %382 = vrcp.f32 %v80_v13 }
 0x1b1   :  { %384 = vpow2.f32 %v163_v11 }
 0x1b3   :  { %v83_v17 = vpop.xlane.xlu1 %82  ;;  %v131_v19 = vpop.xlane.xlu0 %130 }
 0x1b4   :  { %386 = vrcp.f32 %v83_v17  ;;  %vm132_vm8 = vcmp.eq.f32.partialorder %v129_v54, %v131_v19  ;;  %v137_v52 = vcvt.f32.s32 %v131_v19  ;;  %v194_v54 = vrot.slane %v190_v49, 2 }
 0x1b5   :  { %v133_v22 = vsel %vm132_vm8, %v128_v21, inf  ;;  %388 = vpow2.f32 %v165_v15 }
 0x1b6   :  { %134 = vmin.xlane.f32.xlu0 %v133_v22  ;;  %v200_v63 = vadd.f32 %v194_v54, %v188_v46  ;;  %v198_v14 = vsub.f32 %v188_v46, %v194_v54  ;;  %v223_v22 = vsub.s32 %v220_v8, %v217_v5 }
 0x1b7   :  { %v86_v25 = vpop.xlane.xlu1 %85 }
 0x1b8   :  { %390 = vrcp.f32 %v86_v25  ;;  %v208_v15 = vrot.slane %v200_v63, 6 }
 0x1b9   :  { %v379_v18 = vpop.eup %378 }
 0x1ba   :  { %v168_v20 = vmul.f32 %v379_v18, %v377_v16  ;;  %v381_v28 = vpop.eup %380  ;;  %v312_v16 = vsel %vm310_vm14, %v199_v4, %v209_v12  ;;  %v218_v18 = vsub.s32 %v443_v2, %v217_v5 }
 0x1bb   :  { %v146_v23 = vpop.xlane.xlu1 %145 }
 0x1bc   :  { %vm147_vm9 = vcmp.eq.f32.partialorder %v144_v60, %v146_v23  ;;  %vm176_vm10 = vcmp.gt.f32.partialorder %v168_v20, %v175_v27  ;;  %v138_v60 = vshll.u32 %v137_v52, 16  ;;  %v152_v61 = vcvt.f32.s32 %v146_v23 }
 0x1bd   :  { %v383_v29 = vpop.eup %382  ;;  %v148_v30 = vsel %vm147_vm9, %v143_v24, inf  ;;  %v347_v35 = vsel %vm176_vm10, 1.0, %v415_v34  ;;  %v311_v23 = vsel %vm310_vm14, %v198_v14, %v208_v15 }
 0x1be   :  { %149 = vmin.xlane.f32.xlu1 %v148_v30  ;;  %v170_v31 = vmul.f32 %v383_v29, %v381_v28  ;;  %v385_v32 = vpop.eup %384  ;;  %v153_v62 = vshll.u32 %v152_v61, 16  ;;  %v315_v29 = vsel %vm313_vm15, %v312_v16, %v209_v12 }
 0x1c0   :  { %vm177_vm11 = vcmp.gt.f32.partialorder %v170_v31, %v175_v27 }
 0x1c1   :  { %v387_v33 = vpop.eup %386  ;;  %v348_v36 = vsel %vm177_vm11, 1.0, %v415_v34 }
 0x1c2   :  { %v172_v37 = vmul.f32 %v387_v33, %v385_v32  ;;  %v358_v38 = vpack.i.bf16 %v348_v36, %v347_v35  ;;  %v389_v39 = vpop.eup %388 }
 0x1c4   :  { %vm178_vm12 = vcmp.gt.f32.partialorder %v172_v37, %v175_v27 }
 0x1c5   :  { %v391_v40 = vpop.eup %390  ;;  %v349_v42 = vsel %vm178_vm12, 1.0, %v415_v34 }
 0x1c6   :  { %v174_v41 = vmul.f32 %v391_v40, %v389_v39 }
 0x1c8   :  { %vm179_vm13 = vcmp.gt.f32.partialorder %v174_v41, %v175_v27 }
 0x1c9   :  { %v350_v43 = vsel %vm179_vm13, 1.0, %v415_v34 }
 0x1ca   :  { %v363_v44 = vpack.i.bf16 %v350_v43, %v349_v42 }
 0x1cc   :  { %243 = vperm.xlu0 %356, %v168_v20  }
 0x1cf   :  { %246 = vperm.xlu1 %357, %v170_v31   ;;  %v314_v31 = vsel %vm313_vm15, %v311_v23, %v208_v15 }
 0x1d0   :  { %252 = vperm.xlu0 %356, %v174_v41  }
 0x1d3   :  { %249 = vperm.xlu1 %357, %v172_v37  }
 0x1d4   :  { %364 = vperm.xlu0 %356, %v363_v44  }
 0x1d7   :  { %359 = vperm.xlu1 %357, %v358_v38  }
 0x1d8   :  { %v105_v47 = vpop.xlane.xlu0 %104 }
 0x1d9   :  { %v106_v6 = vcvt.f32.s32 %v105_v47 }
 0x1db   :  { %v109_v17 = vadd.s32 %v108_v3, %v106_v6 }
 0x1dc   :  { %v120_v53 = vpop.xlane.xlu1 %119 }
 0x1dd   :  { %v121_v58 = vcvt.f32.s32 %v120_v53  ;;  %v202_v24 = vcvt.s32.f32 %v109_v17 }
 0x1df   :  { %v124_v9 = vadd.s32 %v123_v1, %v121_v58  ;;  %v219_v40 = vrot.slane %v202_v24, %v218_v18 }
 0x1e1   :  { %v203_v25 = vcvt.s32.f32 %v124_v9 }
 0x1e3   :  { %v224_v30 = vrot.slane %v203_v25, %v223_v22 }
 0x1e5   :  { %v226_v47 = vsel %vm225_vm0, %v224_v30, %v219_v40 }
 0x1e6   :  { %v317_v56 = vsel %vm316_vm1, %v314_v31, %v226_v47 }
 0x23f   :  { %v135_v50 = vpop.xlane.xlu0 %134 }
 0x240   :  { %v136_v57 = vcvt.f32.s32 %v135_v50 }
 0x242   :  { %v139_v7 = vadd.s32 %v138_v60, %v136_v57 }
 0x244   :  { %v204_v19 = vcvt.s32.f32 %v139_v7 }
 0x246   :  { %v230_v27 = vrot.slane %v204_v19, %v218_v18 }
 0x247   :  { %v150_v10 = vpop.xlane.xlu1 %149  ;;  %v244_v11 = vpop.permute.xlu0 %243 }
 0x248   :  { %v151_v13 = vcvt.f32.s32 %v150_v10  ;;  %v257_v44 = vrot.slane %v244_v11, %v218_v18 }
 0x24a   :  { %v154_v21 = vadd.s32 %v153_v62, %v151_v13 }
 0x24b   :  { %v247_v0 = vpop.permute.xlu1 %246  ;;  %v253_v26 = vpop.permute.xlu0 %252 }
 0x24c   :  { %v205_v20 = vcvt.s32.f32 %v154_v21  ;;  %v270_v32 = vrot.slane %v253_v26, %v223_v22  ;;  %v261_v2 = vrot.slane %v247_v0, %v223_v22 }
 0x24e   :  { %v234_v28 = vrot.slane %v205_v20, %v223_v22  ;;  %v262_v51 = vsel %vm225_vm0, %v261_v2, %v257_v44 }
 0x24f   :  { %v250_v33 = vpop.permute.xlu1 %249  ;;  %v365_v34 = vpop.permute.xlu0 %364  ;;  %v320_v57 = vsel %vm319_vm2, %v317_v56, %v262_v51 }
 0x250   :  { %v235_v35 = vsel %vm225_vm0, %v234_v28, %v230_v27  ;;  %v266_v36 = vrot.slane %v250_v33, %v218_v18  ;;  %v367_v37 = vunpack.i.h.bf16 %v365_v34  ;;  %v366_v38 = vunpack.i.l.bf16 %v365_v34 }
 0x251   :  { %v318_v39 = vsel %vm316_vm1, %v315_v29, %v235_v35 }
 0x252   :  { %v271_v41 = vsel %vm225_vm0, %v270_v32, %v266_v36  ;;  %v306_v42 = vrot.slane %v367_v37, %v223_v22  ;;  %v302_v43 = vrot.slane %v366_v38, %v218_v18 }
 0x253   :  { %v321_v45 = vsel %vm319_vm2, %v318_v39, %v271_v41  ;;  %v360_v46 = vpop.permute.xlu1 %359 }
 0x254   :  { %v307_v48 = vsel %vm225_vm0, %v306_v42, %v302_v43  ;;  %v362_v49 = vunpack.i.h.bf16 %v360_v46  ;;  %v361_v50 = vunpack.i.l.bf16 %v360_v46 }
 0x255   :  { %v324_v52 = vsel %vm322_vm3, %v321_v45, %v307_v48 }
 0x256   :  { %v297_v53 = vrot.slane %v362_v49, %v223_v22  ;;  %v293_v54 = vrot.slane %v361_v50, %v218_v18  ;;  %v327_v55 = vsel %vm325_vm4, %v324_v52, 0.0 }
 0x257   :  { %330 = vst.msk [vmem:[#allocation4 + $0x8] sm:$0xff] %vm328_vm5, %v327_v55 }
 0x258   :  { %v298_v58 = vsel %vm225_vm0, %v297_v53, %v293_v54 }
 0x259   :  { %v323_v59 = vsel %vm322_vm3, %v320_v57, %v298_v58 }
 0x25a   :  { %v326_v60 = vsel %vm325_vm4, %v323_v59, 0.0 }
 0x25b   :  { %329 = vst.msk [vmem:[#allocation4] sm:$0xff] %vm328_vm5, %v326_v60 }
 0x25c   :  { %403 = shalt.err (!%p400_p4)
}
 0x25d   :  { %s417_s26 = smov 128   ;;  %s418_s27 = smov 8  }
 0x25e   :  { %342 = dma.vmem_to_hbm [thread:$0]  %s337_s24, 256, %s559_s3, [#allocation5], %s417_s26, %s417_s26, %s418_s27  }
 0x25f   :  { %412 = dma.done.wait [#allocation5], 256  }
 0x260   :  { %413 = vsyncadd [#allocation5], 4294967040 }
 0x261   :  { %346 = vsyncpa [#allocation5], 1 }

</bundles_post_ra>
